<compile_context>
chip_gen: v5e
topology: v5e:2x2
jax: 0.10.0
libtpu: 0.0.40
codegen_flags: <defaults>
</compile_context>

<pallas_src>
import jax
import jax.numpy as jnp
from jax.experimental import pallas as pl
from jax.experimental.pallas import tpu as pltpu

DEFAULT_TILE_M = 256            # matches v6e/v7x 256-wide MXU; v5e splits it fine
DEFAULT_TILE_K = 1024           # reduction chunk, only when w1 can't stay resident
RESIDENT_VMEM_BUDGET = 24 << 20  # w1 + x row-tile (double-buffered) budget


def _round_up(x, m):
    return (x + m - 1) // m * m


def _mlp_kernel_resident(x_ref, w1_ref, b1_ref, w2_ref, b2_ref, out_ref):
    """grid=(m_tiles,): whole w1/w2 stay resident in VMEM (DMA'd once per call)."""
    h = jnp.dot(x_ref[...], w1_ref[...], preferred_element_type=jnp.float32)
    h = jnp.maximum(h + b1_ref[...], 0.0)                       # bias + ReLU
    e = jnp.dot(h.astype(w2_ref.dtype), w2_ref[...],
                preferred_element_type=jnp.float32)
    out_ref[...] = (e + b2_ref[...]).astype(out_ref.dtype)


def _mlp_kernel_ktiled(x_ref, w1_ref, b1_ref, w2_ref, b2_ref, out_ref, acc_ref):
    """grid=(m_tiles, k_tiles): f32 VMEM accumulator over the D_in reduction."""
    k = pl.program_id(1)

    @pl.when(k == 0)
    def _():
        acc_ref[...] = jnp.zeros_like(acc_ref)

    acc_ref[...] += jnp.dot(x_ref[...], w1_ref[...],
                            preferred_element_type=jnp.float32)

    @pl.when(k == pl.num_programs(1) - 1)
    def _():
        h = jnp.maximum(acc_ref[...] + b1_ref[...], 0.0)
        e = jnp.dot(h.astype(w2_ref.dtype), w2_ref[...],
                    preferred_element_type=jnp.float32)
        out_ref[...] = (e + b2_ref[...]).astype(out_ref.dtype)


def embedding_net_pallas(x, params, *, compute_dtype=jnp.bfloat16, out_dtype=None):
    """Fused Linear -> ReLU -> Linear on a row slab: [M, D_in] -> [M, E]."""
    w1, b1, w2, b2 = params
    m, d_in = x.shape
    hdim = w1.shape[1]
    edim = w2.shape[1]
    out_dtype = out_dtype or x.dtype

    # Cast once in the wrapper (bf16 MXU path by default); accumulate in f32.
    x = x.astype(compute_dtype)
    w1 = w1.astype(compute_dtype)
    w2 = w2.astype(compute_dtype)
    b1 = b1.astype(jnp.float32)
    b2 = b2.astype(jnp.float32)

    # Lane-align hidden/embedding dims (multiples of 128) so all matmul
    # operands and the output stores are lane-dense (unmasked vst).
    h_pad = _round_up(hdim, 128)
    e_pad = _round_up(edim, 128)
    if h_pad != hdim:
        w1 = jnp.pad(w1, ((0, 0), (0, h_pad - hdim)))
        b1 = jnp.pad(b1, ((0, 0), (0, h_pad - hdim)))
        w2 = jnp.pad(w2, ((0, h_pad - hdim), (0, 0)))
    if e_pad != edim:
        w2 = jnp.pad(w2, ((0, 0), (0, e_pad - edim)))
        b2 = jnp.pad(b2, ((0, 0), (0, e_pad - edim)))

    # Row tiling (triplet slot already folded into M by the caller).
    tile_m = min(DEFAULT_TILE_M, _round_up(m, 8))
    m_pad = _round_up(m, tile_m)
    n_m = m_pad // tile_m
    # Prefer an even number of row tiles so v7x's two TensorCores stay balanced.
    if n_m > 1 and n_m % 2 == 1 and tile_m % 16 == 0:
        tile_m //= 2
        n_m = m_pad // tile_m

    itemsize = jnp.dtype(compute_dtype).itemsize
    out_itemsize = jnp.dtype(out_dtype).itemsize

    # Decide whether w1 (and the full-D x row tile) can stay resident in VMEM.
    d_full = _round_up(w1.shape[0], 128)
    resident_bytes = 2 * (d_full * h_pad + tile_m * d_full) * itemsize
    use_resident = resident_bytes <= RESIDENT_VMEM_BUDGET

    if use_resident:
        d_pad = d_full
        tile_k = d_pad
        n_k = 1
    else:
        tile_k = min(DEFAULT_TILE_K, _round_up(w1.shape[0], 128))
        d_pad = _round_up(w1.shape[0], tile_k)
        n_k = d_pad // tile_k

    # Pad activations / weights to the tiled shapes.  w1's D rows are already
    # padded to a multiple of 128 at init (init_params), so this is a no-op on
    # the resident path for lane-aligned D_in.
    if x.shape != (m_pad, d_pad):
        x = jnp.pad(x, ((0, m_pad - m), (0, d_pad - x.shape[1])))
    if w1.shape[0] != d_pad:
        w1 = jnp.pad(w1, ((0, d_pad - w1.shape[0]), (0, 0)))

    if use_resident:
        grid = (n_m,)
        in_specs = [
            pl.BlockSpec((tile_m, d_pad), lambda i: (i, 0)),     # x row tile
            pl.BlockSpec((d_pad, h_pad), lambda i: (0, 0)),      # w1: DMA'd once
            pl.BlockSpec((1, h_pad), lambda i: (0, 0)),          # b1
            pl.BlockSpec((h_pad, e_pad), lambda i: (0, 0)),      # w2
            pl.BlockSpec((1, e_pad), lambda i: (0, 0)),          # b2
        ]
        out_specs = pl.BlockSpec((tile_m, e_pad), lambda i: (i, 0))
        scratch_shapes = []
        kernel = _mlp_kernel_resident
        dim_sem = ("parallel",)
        w1_reads = 1
        vmem_bytes = (2 * tile_m * d_pad * itemsize
                      + 2 * d_pad * h_pad * itemsize
                      + 2 * h_pad * e_pad * itemsize
                      + 2 * (h_pad + e_pad) * 4
                      + 2 * tile_m * e_pad * out_itemsize)
    else:
        grid = (n_m, n_k)
        in_specs = [
            pl.BlockSpec((tile_m, tile_k), lambda i, k: (i, k)),
            pl.BlockSpec((tile_k, h_pad), lambda i, k: (k, 0)),
            pl.BlockSpec((1, h_pad), lambda i, k: (0, 0)),
            pl.BlockSpec((h_pad, e_pad), lambda i, k: (0, 0)),
            pl.BlockSpec((1, e_pad), lambda i, k: (0, 0)),
        ]
        out_specs = pl.BlockSpec((tile_m, e_pad), lambda i, k: (i, 0))
        scratch_shapes = [pltpu.VMEM((tile_m, h_pad), jnp.float32)]
        kernel = _mlp_kernel_ktiled
        dim_sem = ("parallel", "arbitrary")
        # K-innermost grid re-streams every w1 K-chunk once per row tile.
        w1_reads = n_m
        vmem_bytes = (2 * tile_m * tile_k * itemsize
                      + 2 * tile_k * h_pad * itemsize
                      + 2 * h_pad * e_pad * itemsize
                      + 2 * (h_pad + e_pad) * 4
                      + 2 * tile_m * e_pad * out_itemsize
                      + tile_m * h_pad * 4)

    # Explicit VMEM budget: headroom over the tile footprint, capped below
    # v7x's 64 MiB physical VMEM.
    vmem_limit = int(min(max(2 * vmem_bytes, 16 << 20), 60 << 20))

    flops = 2 * m_pad * (d_pad * h_pad + h_pad * e_pad)
    bytes_accessed = int(m_pad * d_pad * itemsize
                         + w1_reads * d_pad * h_pad * itemsize
                         + h_pad * e_pad * itemsize
                         + (h_pad + e_pad) * 4
                         + m_pad * e_pad * out_itemsize)

    out = pl.pallas_call(
        kernel,
        out_shape=jax.ShapeDtypeStruct((m_pad, e_pad), out_dtype),
        grid_spec=pltpu.PrefetchScalarGridSpec(
            num_scalar_prefetch=0,
            grid=grid,
            in_specs=in_specs,
            out_specs=out_specs,
            scratch_shapes=scratch_shapes,
        ),
        compiler_params=pltpu.CompilerParams(
            dimension_semantics=dim_sem,
            vmem_limit_bytes=vmem_limit),
        cost_estimate=pl.CostEstimate(
            flops=flops, transcendentals=0, bytes_accessed=bytes_accessed),
    )(x, w1, b1, w2, b2)

    return out[:m, :edim]


def triplet_net(i1, i2, i3, params, *, compute_dtype=jnp.bfloat16):
    """TripletNet.forward: returns (E1, E2, E3) with a shared embeddingNet."""
    b = i1.shape[0]
    # Flatten NCHW -> [B, C*H*W] (torch.flatten(x, 1) order) and fold the
    # triplet "slot" axis into the row axis so one shared-weight pallas_call
    # covers all 3B rows: weights are read from HBM once for the whole triplet
    # and there is no 3-way grid axis to unbalance v7x's two TensorCores.
    # The concatenate materializes one extra activation copy in HBM; this is
    # unavoidable while the module's signature takes three separate inputs.
    x = jnp.concatenate(
        [i1.reshape(b, -1), i2.reshape(b, -1), i3.reshape(b, -1)], axis=0)
    emb = embedding_net_pallas(x, params, compute_dtype=compute_dtype,
                               out_dtype=i1.dtype)
    return emb[:b], emb[b:2 * b], emb[2 * b:]


def init_params(key, d_in, hidden, embed, dtype=jnp.float32, pad_d_to=128):
    """Deterministic parameter init (Kaiming-uniform-ish, like nn.Linear).

    w1's D_in rows are padded once here (zero rows are a no-op in the matmul)
    so the kernel never has to re-pad the weights per call.
    """
    k1, k2, k3, k4 = jax.random.split(key, 4)
    lim1 = 1.0 / (d_in ** 0.5)
    lim2 = 1.0 / (hidden ** 0.5)
    w1 = jax.random.uniform(k1, (d_in, hidden), dtype, -lim1, lim1)
    b1 = jax.random.uniform(k2, (1, hidden), dtype, -lim1, lim1)
    w2 = jax.random.uniform(k3, (hidden, embed), dtype, -lim2, lim2)
    b2 = jax.random.uniform(k4, (1, embed), dtype, -lim2, lim2)
    d_pad = _round_up(d_in, pad_d_to)
    if d_pad != d_in:
        w1 = jnp.pad(w1, ((0, d_pad - d_in), (0, 0)))
    return (w1, b1, w2, b2)


if __name__ == "__main__":
    key = jax.random.PRNGKey(0)
    kp, k1, k2, k3 = jax.random.split(key, 4)

    # Small shapes consistent with the module's forward (3 image-like inputs).
    B, C, H, W = 2, 4, 16, 16          # NCHW inputs
    D_IN = C * H * W                   # 1024 (already lane-aligned)
    HIDDEN = 256
    EMBED = 128

    params = init_params(kp, D_IN, HIDDEN, EMBED)

    i1 = jax.random.normal(k1, (B, C, H, W), jnp.float32)
    i2 = jax.random.normal(k2, (B, C, H, W), jnp.float32)
    i3 = jax.random.normal(k3, (B, C, H, W), jnp.float32)

    # Reference (same math as the PyTorch module with this embeddingNet).
    def ref_embed(x):
        xf = x.reshape(x.shape[0], -1)
        h = jnp.maximum(xf @ params[0][:D_IN] + params[1], 0.0)
        return h @ params[2] + params[3]

    r1, r2, r3 = ref_embed(i1), ref_embed(i2), ref_embed(i3)

    # Default path: bf16 MXU compute, f32 accumulation.
    e1, e2, e3 = jax.jit(triplet_net)(i1, i2, i3, params)
    jax.block_until_ready((e1, e2, e3))
    assert e1.shape == (B, EMBED) and e2.shape == (B, EMBED) and e3.shape == (B, EMBED)
    # TODO(synk): keep the hidden activations in f32 for the second matmul if
    # tighter bf16 accuracy is ever needed (currently downcast for MXU rate).
    assert jnp.allclose(e1, r1, atol=1e-1, rtol=1e-1)
    assert jnp.allclose(e2, r2, atol=1e-1, rtol=1e-1)
    assert jnp.allclose(e3, r3, atol=1e-1, rtol=1e-1)

    # f32 compute path for a tight numerical check of the same kernel.
    f1, f2, f3 = triplet_net(i1, i2, i3, params, compute_dtype=jnp.float32)
    jax.block_until_ready((f1, f2, f3))
    assert jnp.allclose(f1, r1, atol=1e-4, rtol=1e-4)
    assert jnp.allclose(f2, r2, atol=1e-4, rtol=1e-4)
    assert jnp.allclose(f3, r3, atol=1e-4, rtol=1e-4)

    print("KERNEL_OK")
</pallas_src>

<mosaic_0001>
module attributes {stable_mosaic.version = 11 : i64} {
  func.func @_mlp_kernel_resident(%arg0: i32, %arg1: memref<8x1024xbf16, #tpu.memory_space<vmem>>, %arg2: memref<1024x256xbf16, #tpu.memory_space<vmem>>, %arg3: memref<1x256xf32, #tpu.memory_space<vmem>>, %arg4: memref<256x128xbf16, #tpu.memory_space<vmem>>, %arg5: memref<1x128xf32, #tpu.memory_space<vmem>>, %arg6: memref<8x128xf32, #tpu.memory_space<vmem>>) attributes {dimension_semantics = [#tpu.dimension_semantics<parallel>], iteration_bounds = array<i64: 1>, scalar_prefetch = 0 : i64, scratch_operands = 0 : i64, tpu.core_type = #tpu.core_type<tc>, window_params = [{transform_indices = @transform_0, window_bounds = array<i64: 8, 1024>}, {pipeline_mode = #tpu.pipeline_mode<synchronous>, transform_indices = @transform_1, window_bounds = array<i64: 1024, 256>}, {pipeline_mode = #tpu.pipeline_mode<synchronous>, transform_indices = @transform_2, window_bounds = array<i64: 1, 256>}, {pipeline_mode = #tpu.pipeline_mode<synchronous>, transform_indices = @transform_3, window_bounds = array<i64: 256, 128>}, {pipeline_mode = #tpu.pipeline_mode<synchronous>, transform_indices = @transform_4, window_bounds = array<i64: 1, 128>}, {transform_indices = @transform_5, window_bounds = array<i64: 8, 128>}]} {
    %c0 = arith.constant 0 : index
    %c0_0 = arith.constant 0 : index
    %0 = vector.load %arg1[%c0, %c0_0] : memref<8x1024xbf16, #tpu.memory_space<vmem>>, vector<8x1024xbf16>
    %c0_1 = arith.constant 0 : index
    %c0_2 = arith.constant 0 : index
    %1 = vector.load %arg2[%c0_1, %c0_2] : memref<1024x256xbf16, #tpu.memory_space<vmem>>, vector<1024x256xbf16>
    %cst = arith.constant dense<0.000000e+00> : vector<8x256xf32>
    %2 = tpu.matmul %0, %1, %cst {dimension_numbers = #tpu.dot_dimension_numbers<[1], [0], [0], [1], [0, 0, 1, 1], [], []>} : vector<8x1024xbf16>, vector<1024x256xbf16>, vector<8x256xf32> -> vector<8x256xf32>
    %c0_3 = arith.constant 0 : index
    %c0_4 = arith.constant 0 : index
    %3 = vector.load %arg3[%c0_3, %c0_4] : memref<1x256xf32, #tpu.memory_space<vmem>>, vector<1x256xf32>
    %4 = vector.broadcast %3 : vector<1x256xf32> to vector<8x256xf32>
    %5 = arith.addf %2, %4 : vector<8x256xf32>
    %cst_5 = arith.constant 0.000000e+00 : f32
    %6 = vector.broadcast %cst_5 : f32 to vector<8x256xf32>
    %7 = arith.maximumf %5, %6 : vector<8x256xf32>
    %8 = arith.truncf %7 : vector<8x256xf32> to vector<8x256xbf16>
    %c0_6 = arith.constant 0 : index
    %c0_7 = arith.constant 0 : index
    %9 = vector.load %arg4[%c0_6, %c0_7] : memref<256x128xbf16, #tpu.memory_space<vmem>>, vector<256x128xbf16>
    %cst_8 = arith.constant dense<0.000000e+00> : vector<8x128xf32>
    %10 = tpu.matmul %8, %9, %cst_8 {dimension_numbers = #tpu.dot_dimension_numbers<[1], [0], [0], [1], [0, 0, 1, 1], [], []>} : vector<8x256xbf16>, vector<256x128xbf16>, vector<8x128xf32> -> vector<8x128xf32>
    %c0_9 = arith.constant 0 : index
    %c0_10 = arith.constant 0 : index
    %11 = vector.load %arg5[%c0_9, %c0_10] : memref<1x128xf32, #tpu.memory_space<vmem>>, vector<1x128xf32>
    %12 = vector.broadcast %11 : vector<1x128xf32> to vector<8x128xf32>
    %13 = arith.addf %10, %12 : vector<8x128xf32>
    %c0_11 = arith.constant 0 : index
    %c0_12 = arith.constant 0 : index
    %14 = vector.load %arg6[%c0_11, %c0_12] : memref<8x128xf32, #tpu.memory_space<vmem>>, vector<8x128xf32>
    tpu.vector_store %arg6[%c0_11, %c0_12], %13 {strides = array<i32>} : memref<8x128xf32, #tpu.memory_space<vmem>>, vector<8x128xf32>,
    return
  }
  func.func @transform_0(%arg0: i32) -> (i32, i32) {
    %c0_i32 = arith.constant 0 : i32
    %c0_i32_0 = arith.constant 0 : i32
    return %arg0, %c0_i32 : i32, i32
  }
  func.func @transform_1(%arg0: i32) -> (i32, i32) {
    %c0_i32 = arith.constant 0 : i32
    %c0_i32_0 = arith.constant 0 : i32
    %c0_i32_1 = arith.constant 0 : i32
    return %c0_i32, %c0_i32_0 : i32, i32
  }
  func.func @transform_2(%arg0: i32) -> (i32, i32) {
    %c0_i32 = arith.constant 0 : i32
    %c0_i32_0 = arith.constant 0 : i32
    %c0_i32_1 = arith.constant 0 : i32
    return %c0_i32, %c0_i32_0 : i32, i32
  }
  func.func @transform_3(%arg0: i32) -> (i32, i32) {
    %c0_i32 = arith.constant 0 : i32
    %c0_i32_0 = arith.constant 0 : i32
    %c0_i32_1 = arith.constant 0 : i32
    return %c0_i32, %c0_i32_0 : i32, i32
  }
  func.func @transform_4(%arg0: i32) -> (i32, i32) {
    %c0_i32 = arith.constant 0 : i32
    %c0_i32_0 = arith.constant 0 : i32
    %c0_i32_1 = arith.constant 0 : i32
    return %c0_i32, %c0_i32_0 : i32, i32
  }
  func.func @transform_5(%arg0: i32) -> (i32, i32) {
    %c0_i32 = arith.constant 0 : i32
    %c0_i32_0 = arith.constant 0 : i32
    return %arg0, %c0_i32 : i32, i32
  }
}

</mosaic_0001>

<bundles_post_ra>
// kernel: triplet_net.1
= control target key start
LH: loop header
LB: loop body
LE: loop exit
PB: predicated region body
PF: predicated region fallthrough
CT: control target
= control target key end

     0   :  { %s2821_s1 = inlined_call_operand.vmem [shape: bf16[1024,256], index: 1, kind: input, shape index: {}]   ;;  %s2822_s0 = inlined_call_operand.vmem [shape: bf16[8,1024], index: 0, kind: input, shape index: {}]   ;;  %s2823_s3 = inlined_call_operand.vmem [shape: bf16[256,128], index: 3, kind: input, shape index: {}]   ;;  %s2824_s4 = inlined_call_operand.vmem [shape: f32[1,128], index: 4, kind: input, shape index: {}]   ;;  %s2825_s2 = inlined_call_operand.vmem [shape: f32[1,256], index: 2, kind: input, shape index: {}]   ;;  %s2826_s5 = inlined_call_operand.vmem [shape: f32[8,128], index: 5, kind: output, shape index: {}]  }
   0x1   :  { %v1259_v0 = vld [vmem:[%s2821_s1 + $0x70] sm:$0xf]  ;;  %v1792_v1 = vld [vmem:[%s2821_s1 + $0x74] sm:$0xf0]  ;;  %v1251_v11 = vld [vmem:[%s2821_s1 + $0x60] sm:$0xf] }
   0x2   :  { %v1323_v2 = vld [vmem:[%s2821_s1 + $0xf0] sm:$0xf]  ;;  %v1260_v3 = vor.u32 %v1792_v1, %v1259_v0  ;;  %v1808_v4 = vld [vmem:[%s2821_s1 + $0xf4] sm:$0xf0]  ;;  %v1790_v13 = vld [vmem:[%s2821_s1 + $0x64] sm:$0xf0] }
   0x3   :  { %v1387_v5 = vld [vmem:[%s2821_s1 + $0x170] sm:$0xf]  ;;  %v1824_v6 = vld [vmem:[%s2821_s1 + $0x174] sm:$0xf0]  ;;  %v1324_v7 = vor.u32 %v1808_v4, %v1323_v2  ;;  %v1315_v14 = vld [vmem:[%s2821_s1 + $0xe0] sm:$0xf]  ;;  %v1252_v16 = vor.u32 %v1790_v13, %v1251_v11 }
   0x4   :  { %v1388_v8 = vor.u32 %v1824_v6, %v1387_v5  ;;  %v1451_v9 = vld [vmem:[%s2821_s1 + $0x1f0] sm:$0xf]  ;;  %v1840_v10 = vld [vmem:[%s2821_s1 + $0x1f4] sm:$0xf0]  ;;  %826 = vmatpush.bf16.msra.mxu0 %v1260_v3  ;;  %v1806_v15 = vld [vmem:[%s2821_s1 + $0xe4] sm:$0xf0] }
   0x5   :  { %v1452_v12 = vor.u32 %v1840_v10, %v1451_v9  ;;  %839 = vmatpush.bf16.msra.mxu1 %v1324_v7  ;;  %v1316_v17 = vor.u32 %v1806_v15, %v1315_v14  ;;  %v1379_v18 = vld [vmem:[%s2821_s1 + $0x160] sm:$0xf]  ;;  %v1822_v19 = vld [vmem:[%s2821_s1 + $0x164] sm:$0xf0]  ;;  %v1243_v23 = vld [vmem:[%s2821_s1 + $0x50] sm:$0xf] }
   0x6   :  { %852 = vmatpush.bf16.msra.mxu2 %v1388_v8  ;;  %v1443_v20 = vld [vmem:[%s2821_s1 + $0x1e0] sm:$0xf]  ;;  %v1380_v21 = vor.u32 %v1822_v19, %v1379_v18  ;;  %v1838_v22 = vld [vmem:[%s2821_s1 + $0x1e4] sm:$0xf0]  ;;  %v1788_v24 = vld [vmem:[%s2821_s1 + $0x54] sm:$0xf0] }
   0x7   :  { %865 = vmatpush.bf16.msra.mxu3 %v1452_v12  ;;  %v1444_v25 = vor.u32 %v1838_v22, %v1443_v20  ;;  %v1307_v26 = vld [vmem:[%s2821_s1 + $0xd0] sm:$0xf]  ;;  %v1804_v27 = vld [vmem:[%s2821_s1 + $0xd4] sm:$0xf0]  ;;  %v1244_v29 = vor.u32 %v1788_v24, %v1243_v23  ;;  %v1235_v35 = vld [vmem:[%s2821_s1 + $0x40] sm:$0xf] }
   0x8   :  { %v1371_v28 = vld [vmem:[%s2821_s1 + $0x150] sm:$0xf]  ;;  %827 = vmatpush.bf16.msra.mxu0 %v1252_v16  ;;  %v1820_v30 = vld [vmem:[%s2821_s1 + $0x154] sm:$0xf0]  ;;  %v1308_v33 = vor.u32 %v1804_v27, %v1307_v26  ;;  %v1786_v36 = vld [vmem:[%s2821_s1 + $0x44] sm:$0xf0] }
   0x9   :  { %v1435_v31 = vld [vmem:[%s2821_s1 + $0x1d0] sm:$0xf]  ;;  %v1836_v32 = vld [vmem:[%s2821_s1 + $0x1d4] sm:$0xf0]  ;;  %840 = vmatpush.bf16.msra.mxu1 %v1316_v17  ;;  %v1372_v34 = vor.u32 %v1820_v30, %v1371_v28  ;;  %v1299_v37 = vld [vmem:[%s2821_s1 + $0xc0] sm:$0xf]  ;;  %v1236_v44 = vor.u32 %v1786_v36, %v1235_v35 }
   0xa   :  { %853 = vmatpush.bf16.msra.mxu2 %v1380_v21  ;;  %v1436_v38 = vor.u32 %v1836_v32, %v1435_v31  ;;  %v1802_v39 = vld [vmem:[%s2821_s1 + $0xc4] sm:$0xf0]  ;;  %v1363_v40 = vld [vmem:[%s2821_s1 + $0x140] sm:$0xf]  ;;  %v1227_v47 = vld [vmem:[%s2821_s1 + $0x30] sm:$0xf] }
   0xb   :  { %866 = vmatpush.bf16.msra.mxu3 %v1444_v25  ;;  %v1818_v41 = vld [vmem:[%s2821_s1 + $0x144] sm:$0xf0]  ;;  %v1427_v42 = vld [vmem:[%s2821_s1 + $0x1c0] sm:$0xf]  ;;  %v1300_v45 = vor.u32 %v1802_v39, %v1299_v37  ;;  %v1784_v48 = vld [vmem:[%s2821_s1 + $0x34] sm:$0xf0] }
   0xc   :  { %v1834_v43 = vld [vmem:[%s2821_s1 + $0x1c4] sm:$0xf0]  ;;  %828 = vmatpush.bf16.msra.mxu0 %v1244_v29  ;;  %v1364_v46 = vor.u32 %v1818_v41, %v1363_v40  ;;  %v1291_v49 = vld [vmem:[%s2821_s1 + $0xb0] sm:$0xf]  ;;  %v1800_v51 = vld [vmem:[%s2821_s1 + $0xb4] sm:$0xf0]  ;;  %v1228_v56 = vor.u32 %v1784_v48, %v1227_v47 }
   0xd   :  { %841 = vmatpush.bf16.msra.mxu1 %v1308_v33  ;;  %v1428_v50 = vor.u32 %v1834_v43, %v1427_v42  ;;  %v1355_v52 = vld [vmem:[%s2821_s1 + $0x130] sm:$0xf]  ;;  %v1816_v53 = vld [vmem:[%s2821_s1 + $0x134] sm:$0xf0]  ;;  %v1292_v57 = vor.u32 %v1800_v51, %v1291_v49  ;;  %v1219_v59 = vld [vmem:[%s2821_s1 + $0x20] sm:$0xf] }
   0xe   :  { %854 = vmatpush.bf16.msra.mxu2 %v1372_v34  ;;  %v1419_v54 = vld [vmem:[%s2821_s1 + $0x1b0] sm:$0xf]  ;;  %v1832_v55 = vld [vmem:[%s2821_s1 + $0x1b4] sm:$0xf0]  ;;  %v1356_v58 = vor.u32 %v1816_v53, %v1355_v52  ;;  %v1782_v60 = vld [vmem:[%s2821_s1 + $0x24] sm:$0xf0] }
   0xf   :  { %867 = vmatpush.bf16.msra.mxu3 %v1436_v38  ;;  %v1283_v61 = vld [vmem:[%s2821_s1 + $0xa0] sm:$0xf]  ;;  %v1420_v62 = vor.u32 %v1832_v55, %v1419_v54  ;;  %v1798_v63 = vld [vmem:[%s2821_s1 + $0xa4] sm:$0xf0]  ;;  %v1220_v4 = vor.u32 %v1782_v60, %v1219_v59  ;;  %v1211_v7 = vld [vmem:[%s2821_s1 + $0x10] sm:$0xf] }
  0x10   :  { %829 = vmatpush.bf16.msra.mxu0 %v1236_v44  ;;  %v1347_v0 = vld [vmem:[%s2821_s1 + $0x120] sm:$0xf]  ;;  %v1814_v1 = vld [vmem:[%s2821_s1 + $0x124] sm:$0xf0]  ;;  %v1284_v5 = vor.u32 %v1798_v63, %v1283_v61  ;;  %v1780_v8 = vld [vmem:[%s2821_s1 + $0x14] sm:$0xf0] }
  0x11   :  { %842 = vmatpush.bf16.msra.mxu1 %v1300_v45  ;;  %v1411_v2 = vld [vmem:[%s2821_s1 + $0x1a0] sm:$0xf]  ;;  %v1830_v3 = vld [vmem:[%s2821_s1 + $0x1a4] sm:$0xf0]  ;;  %v1348_v6 = vor.u32 %v1814_v1, %v1347_v0  ;;  %v1275_v9 = vld [vmem:[%s2821_s1 + $0x90] sm:$0xf]  ;;  %v1212_v16 = vor.u32 %v1780_v8, %v1211_v7 }
  0x12   :  { %855 = vmatpush.bf16.msra.mxu2 %v1364_v46  ;;  %v1412_v10 = vor.u32 %v1830_v3, %v1411_v2  ;;  %v1796_v11 = vld [vmem:[%s2821_s1 + $0x94] sm:$0xf0]  ;;  %v1339_v12 = vld [vmem:[%s2821_s1 + $0x110] sm:$0xf]  ;;  %v1203_v17 = vld [vmem:[%s2821_s1] sm:$0xf] }
  0x13   :  { %868 = vmatpush.bf16.msra.mxu3 %v1428_v50  ;;  %v1812_v13 = vld [vmem:[%s2821_s1 + $0x114] sm:$0xf0]  ;;  %v1403_v14 = vld [vmem:[%s2821_s1 + $0x190] sm:$0xf]  ;;  %v1778_v18 = vld [vmem:[%s2821_s1 + $0x4] sm:$0xf0]  ;;  %v1276_v19 = vor.u32 %v1796_v11, %v1275_v9 }
  0x14   :  { %830 = vmatpush.bf16.msra.mxu0 %v1228_v56  ;;  %v1828_v15 = vld [vmem:[%s2821_s1 + $0x194] sm:$0xf0]  ;;  %v1340_v20 = vor.u32 %v1812_v13, %v1339_v12  ;;  %v1267_v21 = vld [vmem:[%s2821_s1 + $0x80] sm:$0xf]  ;;  %v1794_v22 = vld [vmem:[%s2821_s1 + $0x84] sm:$0xf0]  ;;  %v1204_v31 = vor.u32 %v1778_v18, %v1203_v17 }
  0x15   :  { %843 = vmatpush.bf16.msra.mxu1 %v1292_v57  ;;  %v1331_v23 = vld [vmem:[%s2821_s1 + $0x100] sm:$0xf]  ;;  %v1404_v24 = vor.u32 %v1828_v15, %v1403_v14  ;;  %v1810_v25 = vld [vmem:[%s2821_s1 + $0x104] sm:$0xf0]  ;;  %v1515_v28 = vld [vmem:[%s2821_s1 + $0x270] sm:$0xf]  ;;  %v1268_v35 = vor.u32 %v1794_v22, %v1267_v21 }
  0x16   :  { %856 = vmatpush.bf16.msra.mxu2 %v1356_v58  ;;  %v1395_v26 = vld [vmem:[%s2821_s1 + $0x180] sm:$0xf]  ;;  %v1826_v27 = vld [vmem:[%s2821_s1 + $0x184] sm:$0xf0]  ;;  %v1856_v29 = vld [vmem:[%s2821_s1 + $0x274] sm:$0xf0]  ;;  %v1332_v36 = vor.u32 %v1810_v25, %v1331_v23 }
  0x17   :  { %869 = vmatpush.bf16.msra.mxu3 %v1420_v62  ;;  %v1579_v30 = vld [vmem:[%s2821_s1 + $0x2f0] sm:$0xf]  ;;  %v1872_v32 = vld [vmem:[%s2821_s1 + $0x2f4] sm:$0xf0]  ;;  %v1396_v39 = vor.u32 %v1826_v27, %v1395_v26  ;;  %v1516_v40 = vor.u32 %v1856_v29, %v1515_v28  ;;  %v1507_v43 = vld [vmem:[%s2821_s1 + $0x260] sm:$0xf] }
  0x18   :  { %831 = vmatpush.bf16.msra.mxu0 %v1220_v4  ;;  %v1643_v33 = vld [vmem:[%s2821_s1 + $0x370] sm:$0xf]  ;;  %v1888_v34 = vld [vmem:[%s2821_s1 + $0x374] sm:$0xf0]  ;;  %v1580_v41 = vor.u32 %v1872_v32, %v1579_v30  ;;  %v1854_v44 = vld [vmem:[%s2821_s1 + $0x264] sm:$0xf0] }
  0x19   :  { %844 = vmatpush.bf16.msra.mxu1 %v1284_v5  ;;  %v1707_v37 = vld [vmem:[%s2821_s1 + $0x3f0] sm:$0xf]  ;;  %v1904_v38 = vld [vmem:[%s2821_s1 + $0x3f4] sm:$0xf0]  ;;  %v1644_v42 = vor.u32 %v1888_v34, %v1643_v33  ;;  %v1571_v45 = vld [vmem:[%s2821_s1 + $0x2e0] sm:$0xf]  ;;  %v1508_v53 = vor.u32 %v1854_v44, %v1507_v43 }
  0x1a   :  { %857 = vmatpush.bf16.msra.mxu2 %v1348_v6  ;;  %v1708_v46 = vor.u32 %v1904_v38, %v1707_v37  ;;  %v1870_v47 = vld [vmem:[%s2821_s1 + $0x2e4] sm:$0xf0]  ;;  %v1635_v48 = vld [vmem:[%s2821_s1 + $0x360] sm:$0xf]  ;;  %v1499_v54 = vld [vmem:[%s2821_s1 + $0x250] sm:$0xf] }
  0x1b   :  { %870 = vmatpush.bf16.msra.mxu3 %v1412_v10  ;;  %v1886_v49 = vld [vmem:[%s2821_s1 + $0x364] sm:$0xf0]  ;;  %v1699_v50 = vld [vmem:[%s2821_s1 + $0x3e0] sm:$0xf]  ;;  %v1572_v57 = vor.u32 %v1870_v47, %v1571_v45  ;;  %v1852_v59 = vld [vmem:[%s2821_s1 + $0x254] sm:$0xf0] }
  0x1c   :  { %832 = vmatpush.bf16.msra.mxu0 %v1212_v16  ;;  %v1902_v51 = vld [vmem:[%s2821_s1 + $0x3e4] sm:$0xf0]  ;;  %v1636_v58 = vor.u32 %v1886_v49, %v1635_v48  ;;  %v1563_v60 = vld [vmem:[%s2821_s1 + $0x2d0] sm:$0xf]  ;;  %v1868_v61 = vld [vmem:[%s2821_s1 + $0x2d4] sm:$0xf0]  ;;  %v1500_v8 = vor.u32 %v1852_v59, %v1499_v54 }
  0x1d   :  { %845 = vmatpush.bf16.msra.mxu1 %v1276_v19  ;;  %v21_v52 = vld [vmem:[%s2822_s0 + $0x8] sm:$0xff]  ;;  %v1700_v62 = vor.u32 %v1902_v51, %v1699_v50  ;;  %v1627_v63 = vld [vmem:[%s2821_s1 + $0x350] sm:$0xf]  ;;  %v1884_v0 = vld [vmem:[%s2821_s1 + $0x354] sm:$0xf0]  ;;  %v1564_v9 = vor.u32 %v1868_v61, %v1563_v60 }
  0x1e   :  { %858 = vmatpush.bf16.msra.mxu2 %v1340_v20  ;;  %v164_v55 = vunpack.c.l.b16 %v21_v52  ;;  %v165_v56 = vunpack.c.h.b16 %v21_v52  ;;  %v20_v2 = vld [vmem:[%s2822_s0] sm:$0xff]  ;;  %v1691_v3 = vld [vmem:[%s2821_s1 + $0x3d0] sm:$0xf]  ;;  %v1900_v4 = vld [vmem:[%s2821_s1 + $0x3d4] sm:$0xf0]  ;;  %v1628_v10 = vor.u32 %v1884_v0, %v1627_v63 }
  0x1f   :  { %871 = vmatpush.bf16.msra.mxu3 %v1404_v24  ;;  %v162_v5 = vunpack.c.l.b16 %v20_v2  ;;  %v163_v7 = vunpack.c.h.b16 %v20_v2  ;;  %v1491_v11 = vld [vmem:[%s2821_s1 + $0x240] sm:$0xf]  ;;  %v1850_v12 = vld [vmem:[%s2821_s1 + $0x244] sm:$0xf0]  ;;  %v1692_v16 = vor.u32 %v1900_v4, %v1691_v3  ;;  %v1483_v25 = vld [vmem:[%s2821_s1 + $0x230] sm:$0xf] }
  0x20   :  { %833 = vmatpush.bf16.msra.mxu0 %v1204_v31  ;;  %v2213_v1 = vpack.c.b16 %v164_v55, %v164_v55  ;;  %v2224_v6 = vpack.c.b16 %v165_v56, %v165_v56  ;;  %v1555_v13 = vld [vmem:[%s2821_s1 + $0x2c0] sm:$0xf]  ;;  %v1866_v17 = vld [vmem:[%s2821_s1 + $0x2c4] sm:$0xf0]  ;;  %v1492_v22 = vor.u32 %v1850_v12, %v1491_v11  ;;  %v1848_v26 = vld [vmem:[%s2821_s1 + $0x234] sm:$0xf0] }
  0x21   :  { %846 = vmatpush.bf16.msra.mxu1 %v1268_v35  ;;  %v2236_v14 = vpack.c.b16 %v162_v5, %v162_v5  ;;  %v2238_v15 = vpack.c.b16 %v163_v7, %v163_v7  ;;  %v1619_v18 = vld [vmem:[%s2821_s1 + $0x340] sm:$0xf]  ;;  %v1882_v19 = vld [vmem:[%s2821_s1 + $0x344] sm:$0xf0]  ;;  %v1556_v23 = vor.u32 %v1866_v17, %v1555_v13  ;;  %v1547_v27 = vld [vmem:[%s2821_s1 + $0x2b0] sm:$0xf]  ;;  %v1484_v34 = vor.u32 %v1848_v26, %v1483_v25 }
  0x22   :  { %859 = vmatpush.bf16.msra.mxu2 %v1332_v36  ;;  %v1683_v20 = vld [vmem:[%s2821_s1 + $0x3c0] sm:$0xf]  ;;  %v1898_v21 = vld [vmem:[%s2821_s1 + $0x3c4] sm:$0xf0]  ;;  %v1620_v24 = vor.u32 %v1882_v19, %v1619_v18  ;;  %v1864_v29 = vld [vmem:[%s2821_s1 + $0x2b4] sm:$0xf0] }
  0x23   :  { %872 = vmatpush.bf16.msra.mxu3 %v1396_v39  ;;  %834 = vmatmul.bf16.vlgmr.msra.gmra.mxu0 %v2236_v14  ;;  %v1684_v28 = vor.u32 %v1898_v21, %v1683_v20  ;;  %v1611_v30 = vld [vmem:[%s2821_s1 + $0x330] sm:$0xf]  ;;  %v1880_v31 = vld [vmem:[%s2821_s1 + $0x334] sm:$0xf0]  ;;  %v1548_v35 = vor.u32 %v1864_v29, %v1547_v27  ;;  %v1475_v37 = vld [vmem:[%s2821_s1 + $0x220] sm:$0xf] }
  0x24   :  { %878 = vmatpush.bf16.msrb.mxu0 %v1516_v40  ;;  %847 = vmatmul.bf16.vlgmr.msra.gmra.mxu1 %v2238_v15  ;;  %v1675_v32 = vld [vmem:[%s2821_s1 + $0x3b0] sm:$0xf]  ;;  %v1896_v33 = vld [vmem:[%s2821_s1 + $0x3b4] sm:$0xf0]  ;;  %v1612_v36 = vor.u32 %v1880_v31, %v1611_v30  ;;  %v1846_v38 = vld [vmem:[%s2821_s1 + $0x224] sm:$0xf0] }
  0x25   :  { %891 = vmatpush.bf16.msrb.mxu1 %v1580_v41  ;;  %860 = vmatmul.bf16.vlgmr.msra.gmra.mxu2 %v2213_v1  ;;  %v1539_v39 = vld [vmem:[%s2821_s1 + $0x2a0] sm:$0xf]  ;;  %v1676_v40 = vor.u32 %v1896_v33, %v1675_v32  ;;  %v1862_v41 = vld [vmem:[%s2821_s1 + $0x2a4] sm:$0xf0]  ;;  %v1467_v49 = vld [vmem:[%s2821_s1 + $0x210] sm:$0xf] }
  0x26   :  { %904 = vmatpush.bf16.msrb.mxu2 %v1644_v42  ;;  %873 = vmatmul.bf16.vlgmr.msra.gmra.mxu3 %v2224_v6  ;;  %v1603_v42 = vld [vmem:[%s2821_s1 + $0x320] sm:$0xf]  ;;  %v1878_v43 = vld [vmem:[%s2821_s1 + $0x324] sm:$0xf0]  ;;  %v1540_v47 = vor.u32 %v1862_v41, %v1539_v39  ;;  %v1844_v50 = vld [vmem:[%s2821_s1 + $0x214] sm:$0xf0] }
  0x27   :  { %917 = vmatpush.bf16.msrb.mxu3 %v1708_v46  ;;  %v1667_v44 = vld [vmem:[%s2821_s1 + $0x3a0] sm:$0xf]  ;;  %v1894_v45 = vld [vmem:[%s2821_s1 + $0x3a4] sm:$0xf0]  ;;  %v1476_v46 = vor.u32 %v1846_v38, %v1475_v37  ;;  %v1604_v48 = vor.u32 %v1878_v43, %v1603_v42  ;;  %v1531_v51 = vld [vmem:[%s2821_s1 + $0x290] sm:$0xf]  ;;  %v1468_v59 = vor.u32 %v1844_v50, %v1467_v49 }
  0x28   :  { %879 = vmatpush.bf16.msrb.mxu0 %v1508_v53  ;;  %v1668_v52 = vor.u32 %v1894_v45, %v1667_v44  ;;  %v1860_v53 = vld [vmem:[%s2821_s1 + $0x294] sm:$0xf0]  ;;  %v1595_v54 = vld [vmem:[%s2821_s1 + $0x310] sm:$0xf]  ;;  %v1842_v60 = vld [vmem:[%s2821_s1 + $0x204] sm:$0xf0] }
  0x29   :  { %892 = vmatpush.bf16.msrb.mxu1 %v1572_v57  ;;  %v1876_v55 = vld [vmem:[%s2821_s1 + $0x314] sm:$0xf0]  ;;  %v1659_v56 = vld [vmem:[%s2821_s1 + $0x390] sm:$0xf]  ;;  %v1523_v61 = vld [vmem:[%s2821_s1 + $0x280] sm:$0xf]  ;;  %v1532_v63 = vor.u32 %v1860_v53, %v1531_v51 }
  0x2a   :  { %905 = vmatpush.bf16.msrb.mxu2 %v1636_v58  ;;  %v1892_v57 = vld [vmem:[%s2821_s1 + $0x394] sm:$0xf0]  ;;  %v1459_v58 = vld [vmem:[%s2821_s1 + $0x200] sm:$0xf]  ;;  %v1596_v0 = vor.u32 %v1876_v55, %v1595_v54  ;;  %v1874_v3 = vld [vmem:[%s2821_s1 + $0x304] sm:$0xf0] }
  0x2b   :  { %918 = vmatpush.bf16.msrb.mxu3 %v1700_v62  ;;  %v1858_v62 = vld [vmem:[%s2821_s1 + $0x284] sm:$0xf0]  ;;  %v1587_v2 = vld [vmem:[%s2821_s1 + $0x300] sm:$0xf]  ;;  %v23_v4 = vld [vmem:[%s2822_s0 + $0x18] sm:$0xff]  ;;  %v1660_v5 = vor.u32 %v1892_v57, %v1659_v56  ;;  %v1460_v13 = vor.u32 %v1842_v60, %v1459_v58 }
  0x2c   :  { %880 = vmatpush.bf16.msrb.mxu0 %v1500_v8  ;;  %v1651_v7 = vld [vmem:[%s2821_s1 + $0x380] sm:$0xf]  ;;  %v1890_v8 = vld [vmem:[%s2821_s1 + $0x384] sm:$0xf0]  ;;  %v1261_v11 = vld [vmem:[%s2821_s1 + $0x78] sm:$0xf0]  ;;  %v168_v19 = vunpack.c.l.b16 %v23_v4  ;;  %v1524_v20 = vor.u32 %v1858_v62, %v1523_v61  ;;  %v1588_v21 = vor.u32 %v1874_v3, %v1587_v2  ;;  %v169_v25 = vunpack.c.h.b16 %v23_v4 }
  0x2d   :  { %893 = vmatpush.bf16.msrb.mxu1 %v1564_v9  ;;  %v22_v9 = vld [vmem:[%s2822_s0 + $0x10] sm:$0xff]  ;;  %v1389_v18 = vld [vmem:[%s2821_s1 + $0x178] sm:$0xf0]  ;;  %v1652_v26 = vor.u32 %v1890_v8, %v1651_v7  ;;  %v1789_v31 = vld [vmem:[%s2821_s1 + $0x64] sm:$0xf] }
  0x2e   :  { %906 = vmatpush.bf16.msrb.mxu2 %v1628_v10  ;;  %v1791_v10 = vld [vmem:[%s2821_s1 + $0x74] sm:$0xf]  ;;  %v1253_v32 = vld [vmem:[%s2821_s1 + $0x68] sm:$0xf0]  ;;  %v1805_v33 = vld [vmem:[%s2821_s1 + $0xe4] sm:$0xf] }
  0x2f   :  { %919 = vmatpush.bf16.msrb.mxu3 %v1692_v16  ;;  %v1807_v12 = vld [vmem:[%s2821_s1 + $0xf4] sm:$0xf]  ;;  %v1325_v16 = vld [vmem:[%s2821_s1 + $0xf8] sm:$0xf0]  ;;  %v1264_v27 = vor.u32 %v1791_v10, %v1261_v11  ;;  %v1821_v37 = vld [vmem:[%s2821_s1 + $0x164] sm:$0xf]  ;;  %v1256_v43 = vor.u32 %v1789_v31, %v1253_v32 }
  0x30   :  { %881 = vmatpush.bf16.msrb.mxu0 %v1492_v22  ;;  %v1823_v17 = vld [vmem:[%s2821_s1 + $0x174] sm:$0xf]  ;;  %v1328_v29 = vor.u32 %v1807_v12, %v1325_v16  ;;  %v1381_v38 = vld [vmem:[%s2821_s1 + $0x168] sm:$0xf0]  ;;  %v1837_v41 = vld [vmem:[%s2821_s1 + $0x1e4] sm:$0xf] }
  0x31   :  { %894 = vmatpush.bf16.msrb.mxu1 %v1556_v23  ;;  %v1839_v22 = vld [vmem:[%s2821_s1 + $0x1f4] sm:$0xf]  ;;  %v1453_v23 = vld [vmem:[%s2821_s1 + $0x1f8] sm:$0xf0]  ;;  %v1392_v30 = vor.u32 %v1823_v17, %v1389_v18  ;;  %v1445_v42 = vld [vmem:[%s2821_s1 + $0x1e8] sm:$0xf0] }
  0x32   :  { %907 = vmatpush.bf16.msrb.mxu2 %v1620_v24  ;;  %v166_v24 = vunpack.c.l.b16 %v22_v9  ;;  %v1803_v49 = vld [vmem:[%s2821_s1 + $0xd4] sm:$0xf]  ;;  %v1448_v50 = vor.u32 %v1837_v41, %v1445_v42  ;;  %v1309_v51 = vld [vmem:[%s2821_s1 + $0xd8] sm:$0xf0]  ;;  %v1237_v60 = vld [vmem:[%s2821_s1 + $0x48] sm:$0xf0] }
  0x33   :  { %920 = vmatpush.bf16.msrb.mxu3 %v1684_v28  ;;  %v167_v28 = vunpack.c.h.b16 %v22_v9  ;;  %v1373_v53 = vld [vmem:[%s2821_s1 + $0x158] sm:$0xf0]  ;;  %v1835_v54 = vld [vmem:[%s2821_s1 + $0x1d4] sm:$0xf]  ;;  %v1312_v57 = vor.u32 %v1803_v49, %v1309_v51  ;;  %v1801_v61 = vld [vmem:[%s2821_s1 + $0xc4] sm:$0xf] }
  0x34   :  { %882 = vmatpush.bf16.msrb.mxu0 %v1484_v34  ;;  %v1456_v34 = vor.u32 %v1839_v22, %v1453_v23  ;;  %v2404_v39 = vpack.c.b16 %v166_v24, %v166_v24  ;;  %v1437_v55 = vld [vmem:[%s2821_s1 + $0x1d8] sm:$0xf0]  ;;  %v1365_v2 = vld [vmem:[%s2821_s1 + $0x148] sm:$0xf0]  ;;  %v1833_v3 = vld [vmem:[%s2821_s1 + $0x1c4] sm:$0xf] }
  0x35   :  { %895 = vmatpush.bf16.msrb.mxu1 %v1548_v35  ;;  %v2393_v35 = vpack.c.b16 %v168_v19, %v168_v19  ;;  %v2414_v44 = vpack.c.b16 %v167_v28, %v167_v28  ;;  %v1440_v62 = vor.u32 %v1835_v54, %v1437_v55  ;;  %v1429_v4 = vld [vmem:[%s2821_s1 + $0x1c8] sm:$0xf0]  ;;  %v1783_v9 = vld [vmem:[%s2821_s1 + $0x34] sm:$0xf]  ;;  %v1229_v10 = vld [vmem:[%s2821_s1 + $0x38] sm:$0xf0] }
  0x36   :  { %908 = vmatpush.bf16.msrb.mxu2 %v1612_v36  ;;  %v1317_v36 = vld [vmem:[%s2821_s1 + $0xe8] sm:$0xf0]  ;;  %v1799_v11 = vld [vmem:[%s2821_s1 + $0xb4] sm:$0xf]  ;;  %v1432_v12 = vor.u32 %v1833_v3, %v1429_v4  ;;  %v1357_v17 = vld [vmem:[%s2821_s1 + $0x138] sm:$0xf0] }
  0x37   :  { %921 = vmatpush.bf16.msrb.mxu3 %v1676_v40  ;;  %v2406_v40 = vpack.c.b16 %v169_v25, %v169_v25  ;;  %v1320_v45 = vor.u32 %v1805_v33, %v1317_v36  ;;  %v1815_v16 = vld [vmem:[%s2821_s1 + $0x134] sm:$0xf]  ;;  %v1421_v19 = vld [vmem:[%s2821_s1 + $0x1b8] sm:$0xf0]  ;;  %v1781_v23 = vld [vmem:[%s2821_s1 + $0x24] sm:$0xf] }
  0x38   :  { %883 = vmatpush.bf16.msrb.mxu0 %v1476_v46  ;;  %v1384_v46 = vor.u32 %v1821_v37, %v1381_v38  ;;  %v1831_v18 = vld [vmem:[%s2821_s1 + $0x1b4] sm:$0xf]  ;;  %v1360_v22 = vor.u32 %v1815_v16, %v1357_v17  ;;  %v1221_v24 = vld [vmem:[%s2821_s1 + $0x28] sm:$0xf0]  ;;  %v1797_v25 = vld [vmem:[%s2821_s1 + $0xa4] sm:$0xf] }
  0x39   :  { %896 = vmatpush.bf16.msrb.mxu1 %v1540_v47  ;;  %v1787_v47 = vld [vmem:[%s2821_s1 + $0x54] sm:$0xf]  ;;  %v1813_v28 = vld [vmem:[%s2821_s1 + $0x124] sm:$0xf]  ;;  %v1413_v31 = vld [vmem:[%s2821_s1 + $0x1a8] sm:$0xf0]  ;;  %v1224_v32 = vor.u32 %v1781_v23, %v1221_v24 }
  0x3a   :  { %909 = vmatpush.bf16.msrb.mxu2 %v1604_v48  ;;  %v1245_v48 = vld [vmem:[%s2821_s1 + $0x58] sm:$0xf0]  ;;  %v1779_v36 = vld [vmem:[%s2821_s1 + $0x14] sm:$0xf]  ;;  %v1777_v49 = vld [vmem:[%s2821_s1 + $0x4] sm:$0xf] }
  0x3b   :  { %922 = vmatpush.bf16.msrb.mxu3 %v1668_v52  ;;  %v1819_v52 = vld [vmem:[%s2821_s1 + $0x154] sm:$0xf]  ;;  %v1248_v56 = vor.u32 %v1787_v47, %v1245_v48  ;;  %v1213_v37 = vld [vmem:[%s2821_s1 + $0x18] sm:$0xf0]  ;;  %v1269_v54 = vld [vmem:[%s2821_s1 + $0x88] sm:$0xf0] }
  0x3c   :  { %884 = vmatpush.bf16.msrb.mxu0 %v1468_v59  ;;  %v1376_v58 = vor.u32 %v1819_v52, %v1373_v53  ;;  %v1785_v59 = vld [vmem:[%s2821_s1 + $0x44] sm:$0xf]  ;;  %v1795_v38 = vld [vmem:[%s2821_s1 + $0x94] sm:$0xf]  ;;  %v1277_v42 = vld [vmem:[%s2821_s1 + $0x98] sm:$0xf0]  ;;  %v1216_v48 = vor.u32 %v1779_v36, %v1213_v37 }
  0x3d   :  { %897 = vmatpush.bf16.msrb.mxu1 %v1532_v63  ;;  %v1301_v63 = vld [vmem:[%s2821_s1 + $0xc8] sm:$0xf0]  ;;  %v1405_v47 = vld [vmem:[%s2821_s1 + $0x198] sm:$0xf0]  ;;  %v1280_v51 = vor.u32 %v1795_v38, %v1277_v42  ;;  %v1793_v53 = vld [vmem:[%s2821_s1 + $0x84] sm:$0xf] }
  0x3e   :  { %910 = vmatpush.bf16.msrb.mxu2 %v1596_v0  ;;  %v1817_v0 = vld [vmem:[%s2821_s1 + $0x144] sm:$0xf]  ;;  %v1304_v7 = vor.u32 %v1801_v61, %v1301_v63  ;;  %v1517_v61 = vld [vmem:[%s2821_s1 + $0x278] sm:$0xf0]  ;;  %v1272_v4 = vor.u32 %v1793_v53, %v1269_v54  ;;  %v1509_v16 = vld [vmem:[%s2821_s1 + $0x268] sm:$0xf0] }
  0x3f   :  { %923 = vmatpush.bf16.msrb.mxu3 %v1660_v5  ;;  %v1240_v5 = vor.u32 %v1785_v59, %v1237_v60  ;;  %v1368_v8 = vor.u32 %v1817_v0, %v1365_v2  ;;  %v1809_v55 = vld [vmem:[%s2821_s1 + $0x104] sm:$0xf]  ;;  %v1397_v59 = vld [vmem:[%s2821_s1 + $0x188] sm:$0xf0]  ;;  %v1855_v60 = vld [vmem:[%s2821_s1 + $0x274] sm:$0xf] }
  0x40   :  { %885 = vmatpush.bf16.msrb.mxu0 %v1460_v13  ;;  %v1293_v13 = vld [vmem:[%s2821_s1 + $0xb8] sm:$0xf0]  ;;  %v1887_v2 = vld [vmem:[%s2821_s1 + $0x374] sm:$0xf]  ;;  %v1869_v17 = vld [vmem:[%s2821_s1 + $0x2e4] sm:$0xf] }
  0x41   :  { %898 = vmatpush.bf16.msrb.mxu1 %v1524_v20  ;;  %v1232_v20 = vor.u32 %v1783_v9, %v1229_v10  ;;  %v1581_v0 = vld [vmem:[%s2821_s1 + $0x2f8] sm:$0xf0]  ;;  %v1520_v10 = vor.u32 %v1855_v60, %v1517_v61  ;;  %v1701_v23 = vld [vmem:[%s2821_s1 + $0x3e8] sm:$0xf0]  ;;  %v1863_v53 = vld [vmem:[%s2821_s1 + $0x2b4] sm:$0xf] }
  0x42   :  { %911 = vmatpush.bf16.msrb.mxu2 %v1588_v21  ;;  %v1296_v21 = vor.u32 %v1799_v11, %v1293_v13  ;;  %v1645_v3 = vld [vmem:[%s2821_s1 + $0x378] sm:$0xf0]  ;;  %v1853_v13 = vld [vmem:[%s2821_s1 + $0x264] sm:$0xf]  ;;  %v1493_v42 = vld [vmem:[%s2821_s1 + $0x248] sm:$0xf0] }
  0x43   :  { %924 = vmatpush.bf16.msrb.mxu3 %v1652_v26  ;;  %886 = vmatmul.bf16.vlgmr.msrb.gmra.mxu0 %v2404_v39  ;;  %v1424_v26 = vor.u32 %v1831_v18, %v1421_v19  ;;  %v1573_v19 = vld [vmem:[%s2821_s1 + $0x2e8] sm:$0xf0]  ;;  %v1512_v24 = vor.u32 %v1853_v13, %v1509_v16  ;;  %v1843_v13 = vld [vmem:[%s2821_s1 + $0x214] sm:$0xf]  ;;  %v1469_v16 = vld [vmem:[%s2821_s1 + $0x218] sm:$0xf0] }
  0x44   :  { %930 = vmatpush.bf16.msra.mxu0 %v1264_v27  ;;  %899 = vmatmul.bf16.vlgmr.msrb.gmra.mxu1 %v2414_v44  ;;  %v1285_v27 = vld [vmem:[%s2821_s1 + $0xa8] sm:$0xf0] }
  0x45   :  { %943 = vmatpush.bf16.msra.mxu1 %v1328_v29  ;;  %912 = vmatmul.bf16.vlgmr.msrb.gmra.mxu2 %v2393_v35  ;;  %v1349_v29 = vld [vmem:[%s2821_s1 + $0x128] sm:$0xf0]  ;;  %v1288_v33 = vor.u32 %v1797_v25, %v1285_v27  ;;  %v1576_v25 = vor.u32 %v1869_v17, %v1573_v19  ;;  %v1851_v27 = vld [vmem:[%s2821_s1 + $0x254] sm:$0xf]  ;;  %v1533_v19 = vld [vmem:[%s2821_s1 + $0x298] sm:$0xf0] }
  0x46   :  { %956 = vmatpush.bf16.msra.mxu2 %v1392_v30  ;;  %925 = vmatmul.bf16.vlgmr.msrb.gmra.mxu3 %v2406_v40  ;;  %v1829_v30 = vld [vmem:[%s2821_s1 + $0x1a4] sm:$0xf]  ;;  %v1859_v17 = vld [vmem:[%s2821_s1 + $0x294] sm:$0xf] }
  0x47   :  { %969 = vmatpush.bf16.msra.mxu3 %v1456_v34  ;;  %v1352_v34 = vor.u32 %v1813_v28, %v1349_v29  ;;  %v1416_v41 = vor.u32 %v1829_v30, %v1413_v31  ;;  %v1501_v28 = vld [vmem:[%s2821_s1 + $0x258] sm:$0xf0]  ;;  %v1867_v29 = vld [vmem:[%s2821_s1 + $0x2d4] sm:$0xf] }
  0x48   :  { %931 = vmatpush.bf16.msra.mxu0 %v1256_v43  ;;  %v1811_v43 = vld [vmem:[%s2821_s1 + $0x114] sm:$0xf]  ;;  %v1565_v31 = vld [vmem:[%s2821_s1 + $0x2d8] sm:$0xf0]  ;;  %v1504_v36 = vor.u32 %v1851_v27, %v1501_v28  ;;  %v1841_v27 = vld [vmem:[%s2821_s1 + $0x204] sm:$0xf] }
  0x49   :  { %944 = vmatpush.bf16.msra.mxu1 %v1320_v45  ;;  %v1341_v45 = vld [vmem:[%s2821_s1 + $0x118] sm:$0xf0]  ;;  %v1568_v37 = vor.u32 %v1867_v29, %v1565_v31  ;;  %v1461_v28 = vld [vmem:[%s2821_s1 + $0x208] sm:$0xf0]  ;;  %v1857_v29 = vld [vmem:[%s2821_s1 + $0x284] sm:$0xf] }
  0x4a   :  { %957 = vmatpush.bf16.msra.mxu2 %v1384_v46  ;;  %v1827_v46 = vld [vmem:[%s2821_s1 + $0x194] sm:$0xf]  ;;  %v1344_v52 = vor.u32 %v1811_v43, %v1341_v45  ;;  %v1881_v43 = vld [vmem:[%s2821_s1 + $0x344] sm:$0xf]  ;;  %v1621_v45 = vld [vmem:[%s2821_s1 + $0x348] sm:$0xf0] }
  0x4b   :  { %970 = vmatpush.bf16.msra.mxu3 %v1448_v50  ;;  %v1205_v50 = vld [vmem:[%s2821_s1 + $0x8] sm:$0xf0] }
  0x4c   :  { %932 = vmatpush.bf16.msra.mxu0 %v1248_v56  ;;  %v1408_v56 = vor.u32 %v1827_v46, %v1405_v47  ;;  %v1208_v63 = vor.u32 %v1777_v49, %v1205_v50  ;;  %v1897_v46 = vld [vmem:[%s2821_s1 + $0x3c4] sm:$0xf]  ;;  %v1685_v47 = vld [vmem:[%s2821_s1 + $0x3c8] sm:$0xf0]  ;;  %v1624_v50 = vor.u32 %v1881_v43, %v1621_v45 }
  0x4d   :  { %945 = vmatpush.bf16.msra.mxu1 %v1312_v57  ;;  %v1333_v57 = vld [vmem:[%s2821_s1 + $0x108] sm:$0xf0]  ;;  %v1688_v54 = vor.u32 %v1897_v46, %v1685_v47  ;;  %v152_v46 = vld [vmem:[%s2825_s2] sm:$0x3] }
  0x4e   :  { %958 = vmatpush.bf16.msra.mxu2 %v1376_v58  ;;  %v1825_v58 = vld [vmem:[%s2821_s1 + $0x184] sm:$0xf]  ;;  %v1525_v31 = vld [vmem:[%s2821_s1 + $0x288] sm:$0xf0] }
  0x4f   :  { %971 = vmatpush.bf16.msra.mxu3 %v1440_v62  ;;  %v1871_v62 = vld [vmem:[%s2821_s1 + $0x2f4] sm:$0xf]  ;;  %v1400_v9 = vor.u32 %v1825_v58, %v1397_v59  ;;  %v1677_v59 = vld [vmem:[%s2821_s1 + $0x3b8] sm:$0xf0]  ;;  %v1906_v43 = vld [vmem:[%s2823_s3 + $0x8] sm:$0xff] }
  0x50   :  { %933 = vmatpush.bf16.msra.mxu0 %v1240_v5  ;;  %v1336_v5 = vor.u32 %v1809_v55, %v1333_v57  ;;  %v1584_v11 = vor.u32 %v1871_v62, %v1581_v0  ;;  %v1549_v55 = vld [vmem:[%s2821_s1 + $0x2b8] sm:$0xf0]  ;;  %v1895_v58 = vld [vmem:[%s2821_s1 + $0x3b4] sm:$0xf]  ;;  %v1477_v0 = vld [vmem:[%s2821_s1 + $0x228] sm:$0xf0] }
  0x51   :  { %946 = vmatpush.bf16.msra.mxu1 %v1304_v7  ;;  %v1903_v7 = vld [vmem:[%s2821_s1 + $0x3f4] sm:$0xf]  ;;  %v1613_v57 = vld [vmem:[%s2821_s1 + $0x338] sm:$0xf0]  ;;  %v1552_v61 = vor.u32 %v1863_v53, %v1549_v55 }
  0x52   :  { %959 = vmatpush.bf16.msra.mxu2 %v1368_v8  ;;  %v1709_v8 = vld [vmem:[%s2821_s1 + $0x3f8] sm:$0xf0] }
  0x53   :  { %972 = vmatpush.bf16.msra.mxu3 %v1432_v12  ;;  %v1648_v12 = vor.u32 %v1887_v2, %v1645_v3  ;;  %v1712_v18 = vor.u32 %v1903_v7, %v1709_v8  ;;  %v1861_v2 = vld [vmem:[%s2821_s1 + $0x2a4] sm:$0xf]  ;;  %v1680_v3 = vor.u32 %v1895_v58, %v1677_v59  ;;  %v1605_v7 = vld [vmem:[%s2821_s1 + $0x328] sm:$0xf0] }
  0x54   :  { %934 = vmatpush.bf16.msra.mxu0 %v1232_v20  ;;  %v1885_v20 = vld [vmem:[%s2821_s1 + $0x364] sm:$0xf] }
  0x55   :  { %947 = vmatpush.bf16.msra.mxu1 %v1296_v21  ;;  %v1637_v21 = vld [vmem:[%s2821_s1 + $0x368] sm:$0xf0]  ;;  %v1893_v8 = vld [vmem:[%s2821_s1 + $0x3a4] sm:$0xf] }
  0x56   :  { %960 = vmatpush.bf16.msra.mxu2 %v1360_v22  ;;  %v1901_v22 = vld [vmem:[%s2821_s1 + $0x3e4] sm:$0xf] }
  0x57   :  { %973 = vmatpush.bf16.msra.mxu3 %v1424_v26  ;;  %v1640_v26 = vor.u32 %v1885_v20, %v1637_v21  ;;  %v1704_v30 = vor.u32 %v1901_v22, %v1701_v23  ;;  %v1875_v20 = vld [vmem:[%s2821_s1 + $0x314] sm:$0xf]  ;;  %v1597_v21 = vld [vmem:[%s2821_s1 + $0x318] sm:$0xf0] }
  0x58   :  { %935 = vmatpush.bf16.msra.mxu0 %v1224_v32  ;;  %v1883_v32 = vld [vmem:[%s2821_s1 + $0x354] sm:$0xf]  ;;  %v1661_v23 = vld [vmem:[%s2821_s1 + $0x398] sm:$0xf0] }
  0x59   :  { %948 = vmatpush.bf16.msra.mxu1 %v1288_v33  ;;  %v1629_v33 = vld [vmem:[%s2821_s1 + $0x358] sm:$0xf0]  ;;  %v1891_v22 = vld [vmem:[%s2821_s1 + $0x394] sm:$0xf] }
  0x5a   :  { %961 = vmatpush.bf16.msra.mxu2 %v1352_v34  ;;  %v1899_v34 = vld [vmem:[%s2821_s1 + $0x3d4] sm:$0xf]  ;;  %v1632_v38 = vor.u32 %v1883_v32, %v1629_v33  ;;  %v1873_v32 = vld [vmem:[%s2821_s1 + $0x304] sm:$0xf]  ;;  %v1589_v33 = vld [vmem:[%s2821_s1 + $0x308] sm:$0xf0] }
  0x5b   :  { %974 = vmatpush.bf16.msra.mxu3 %v1416_v41  ;;  %v1849_v41 = vld [vmem:[%s2821_s1 + $0x244] sm:$0xf] }
  0x5c   :  { %936 = vmatpush.bf16.msra.mxu0 %v1216_v48  ;;  %v1496_v48 = vor.u32 %v1849_v41, %v1493_v42  ;;  %v1912_v42 = vld [vmem:[%s2823_s3 + $0x38] sm:$0xff] }
  0x5d   :  { %949 = vmatpush.bf16.msra.mxu1 %v1280_v51  ;;  %v1847_v51 = vld [vmem:[%s2821_s1 + $0x234] sm:$0xf] }
  0x5e   :  { %962 = vmatpush.bf16.msra.mxu2 %v1344_v52  ;;  %v1485_v52 = vld [vmem:[%s2821_s1 + $0x238] sm:$0xf0] }
  0x5f   :  { %975 = vmatpush.bf16.msra.mxu3 %v1408_v56  ;;  %v1879_v56 = vld [vmem:[%s2821_s1 + $0x334] sm:$0xf]  ;;  %v1488_v60 = vor.u32 %v1847_v51, %v1485_v52 }
  0x60   :  { %937 = vmatpush.bf16.msra.mxu0 %v1208_v63  ;;  %v1616_v62 = vor.u32 %v1879_v56, %v1613_v57  ;;  %v1845_v63 = vld [vmem:[%s2821_s1 + $0x224] sm:$0xf] }
  0x61   :  { %950 = vmatpush.bf16.msra.mxu1 %v1272_v4  ;;  %v1541_v4 = vld [vmem:[%s2821_s1 + $0x2a8] sm:$0xf0] }
  0x62   :  { %963 = vmatpush.bf16.msra.mxu2 %v1336_v5  ;;  %v1877_v5 = vld [vmem:[%s2821_s1 + $0x324] sm:$0xf] }
  0x63   :  { %976 = vmatpush.bf16.msra.mxu3 %v1400_v9  ;;  %938 = vmatmul.bf16.vlgmr.msra.gmra.mxu0 %v2236_v14  ;;  %v1669_v9 = vld [vmem:[%s2821_s1 + $0x3a8] sm:$0xf0] }
  0x64   :  { %982 = vmatpush.bf16.msrb.mxu0 %v1520_v10  ;;  %951 = vmatmul.bf16.vlgmr.msra.gmra.mxu1 %v2238_v15  ;;  %v1557_v15 = vld [vmem:[%s2821_s1 + $0x2c8] sm:$0xf0]  ;;  %v1480_v10 = vor.u32 %v1845_v63, %v1477_v0 }
  0x65   :  { %995 = vmatpush.bf16.msrb.mxu1 %v1584_v11  ;;  %964 = vmatmul.bf16.vlgmr.msra.gmra.mxu2 %v2213_v1  ;;  %v1693_v1 = vld [vmem:[%s2821_s1 + $0x3d8] sm:$0xf0]  ;;  %v1544_v11 = vor.u32 %v1861_v2, %v1541_v4 }
  0x66   :  { %1008 = vmatpush.bf16.msrb.mxu2 %v1648_v12  ;;  %977 = vmatmul.bf16.vlgmr.msra.gmra.mxu3 %v2224_v6  ;;  %v1865_v6 = vld [vmem:[%s2821_s1 + $0x2c4] sm:$0xf]  ;;  %v1696_v14 = vor.u32 %v1899_v34, %v1693_v1  ;;  %v1608_v12 = vor.u32 %v1877_v5, %v1605_v7  ;;  %v1653_v1 = vld [vmem:[%s2821_s1 + $0x388] sm:$0xf0]  ;;  %v1920_v2 = vld [vmem:[%s2823_s3 + $0x78] sm:$0xff] }
  0x67   :  { %1021 = vmatpush.bf16.msrb.mxu3 %v1712_v18  ;;  %v1560_v49 = vor.u32 %v1865_v6, %v1557_v15  ;;  %v1672_v18 = vor.u32 %v1893_v8, %v1669_v9  ;;  %v1889_v34 = vld [vmem:[%s2821_s1 + $0x384] sm:$0xf]  ;;  %v1911_v6 = vld [vmem:[%s2823_s3 + $0x30] sm:$0xff] }
  0x68   :  { %983 = vmatpush.bf16.msrb.mxu0 %v1512_v24  ;;  %v1472_v24 = vor.u32 %v1843_v13, %v1469_v16  ;;  %v1656_v41 = vor.u32 %v1889_v34, %v1653_v1  ;;  %v1919_v5 = vld [vmem:[%s2823_s3 + $0x70] sm:$0xff]  ;;  %v1917_v13 = vld [vmem:[%s2823_s3 + $0x60] sm:$0xff]  ;;  %v1916_v16 = vld [vmem:[%s2823_s3 + $0x58] sm:$0xff] }
  0x69   :  { %996 = vmatpush.bf16.msrb.mxu1 %v1576_v25  ;;  %v1536_v25 = vor.u32 %v1859_v17, %v1533_v19  ;;  %v1915_v17 = vld [vmem:[%s2823_s3 + $0x50] sm:$0xff] }
  0x6a   :  { %1009 = vmatpush.bf16.msrb.mxu2 %v1640_v26  ;;  %v1600_v26 = vor.u32 %v1875_v20, %v1597_v21  ;;  %v1914_v20 = vld [vmem:[%s2823_s3 + $0x48] sm:$0xff] }
  0x6b   :  { %1022 = vmatpush.bf16.msrb.mxu3 %v1704_v30  ;;  %v1664_v30 = vor.u32 %v1891_v22, %v1661_v23 }
  0x6c   :  { %984 = vmatpush.bf16.msrb.mxu0 %v1504_v36  ;;  %v1464_v36 = vor.u32 %v1841_v27, %v1461_v28 }
  0x6d   :  { %997 = vmatpush.bf16.msrb.mxu1 %v1568_v37  ;;  %v1528_v37 = vor.u32 %v1857_v29, %v1525_v31 }
  0x6e   :  { %1010 = vmatpush.bf16.msrb.mxu2 %v1632_v38  ;;  %v1592_v38 = vor.u32 %v1873_v32, %v1589_v33 }
  0x6f   :  { %1023 = vmatpush.bf16.msrb.mxu3 %v1696_v14  ;;  %v1910_v14 = vld [vmem:[%s2823_s3 + $0x28] sm:$0xff] }
  0x70   :  { %985 = vmatpush.bf16.msrb.mxu0 %v1496_v48  ;;  %v1905_v48 = vld [vmem:[%s2823_s3] sm:$0xff] }
  0x71   :  { %998 = vmatpush.bf16.msrb.mxu1 %v1560_v49  ;;  %v154_v49 = vperm.slane %v152_v46, 0 }
  0x72   :  { %1011 = vmatpush.bf16.msrb.mxu2 %v1624_v50 }
  0x73   :  { %1024 = vmatpush.bf16.msrb.mxu3 %v1688_v54 }
  0x74   :  { %986 = vmatpush.bf16.msrb.mxu0 %v1488_v60 }
  0x75   :  { %999 = vmatpush.bf16.msrb.mxu1 %v1552_v61 }
  0x76   :  { %1012 = vmatpush.bf16.msrb.mxu2 %v1616_v62 }
  0x77   :  { %1025 = vmatpush.bf16.msrb.mxu3 %v1680_v3 }
  0x78   :  { %987 = vmatpush.bf16.msrb.mxu0 %v1480_v10  ;;  %v1918_v10 = vld [vmem:[%s2823_s3 + $0x68] sm:$0xff] }
  0x79   :  { %1000 = vmatpush.bf16.msrb.mxu1 %v1544_v11 }
  0x7a   :  { %1013 = vmatpush.bf16.msrb.mxu2 %v1608_v12 }
  0x7b   :  { %1026 = vmatpush.bf16.msrb.mxu3 %v1672_v18 }
  0x7c   :  { %988 = vmatpush.bf16.msrb.mxu0 %v1472_v24  ;;  %v1913_v24 = vld [vmem:[%s2823_s3 + $0x40] sm:$0xff] }
  0x7d   :  { %1001 = vmatpush.bf16.msrb.mxu1 %v1536_v25 }
  0x7e   :  { %1014 = vmatpush.bf16.msrb.mxu2 %v1600_v26  ;;  %v155_v26 = vperm.slane %v152_v46, 1 }
  0x7f   :  { %1027 = vmatpush.bf16.msrb.mxu3 %v1664_v30 }
  0x80   :  { %989 = vmatpush.bf16.msrb.mxu0 %v1464_v36 }
  0x81   :  { %1002 = vmatpush.bf16.msrb.mxu1 %v1528_v37 }
  0x82   :  { %1015 = vmatpush.bf16.msrb.mxu2 %v1592_v38 }
  0x83   :  { %1028 = vmatpush.bf16.msrb.mxu3 %v1656_v41  ;;  %990 = vmatmul.bf16.vlgmr.msrb.gmra.mxu0 %v2404_v39  ;;  %v1909_v39 = vld [vmem:[%s2823_s3 + $0x20] sm:$0xff] }
  0x84   :  { %1170 = vmatpush.bf16.msra.mxu0 %v1912_v42  ;;  %1003 = vmatmul.bf16.vlgmr.msrb.gmra.mxu1 %v2414_v44 }
  0x85   :  { %1016 = vmatmul.bf16.vlgmr.msrb.gmra.mxu2 %v2393_v35  ;;  %v1908_v35 = vld [vmem:[%s2823_s3 + $0x18] sm:$0xff]  ;;  %1183 = vmatpush.bf16.msra.mxu1 %v1920_v2 }
  0x86   :  { %1029 = vmatmul.bf16.vlgmr.msrb.gmra.mxu3 %v2406_v40  ;;  %v1907_v40 = vld [vmem:[%s2823_s3 + $0x10] sm:$0xff] }
  0x88   :  { %1171 = vmatpush.bf16.msra.mxu0 %v1911_v6 }
  0x89   :  { %1184 = vmatpush.bf16.msra.mxu1 %v1919_v5 }
  0x8c   :  { %1172 = vmatpush.bf16.msra.mxu0 %v1910_v14 }
  0x8d   :  { %1185 = vmatpush.bf16.msra.mxu1 %v1918_v10 }
  0x90   :  { %1173 = vmatpush.bf16.msra.mxu0 %v1909_v39 }
  0x91   :  { %1186 = vmatpush.bf16.msra.mxu1 %v1917_v13 }
  0x94   :  { %1174 = vmatpush.bf16.msra.mxu0 %v1908_v35 }
  0x95   :  { %1187 = vmatpush.bf16.msra.mxu1 %v1916_v16 }
  0x98   :  { %1175 = vmatpush.bf16.msra.mxu0 %v1907_v40 }
  0x99   :  { %1188 = vmatpush.bf16.msra.mxu1 %v1915_v17 }
  0x9c   :  { %1176 = vmatpush.bf16.msra.mxu0 %v1906_v43 }
  0x9d   :  { %1189 = vmatpush.bf16.msra.mxu1 %v1914_v20 }
  0xa0   :  { %v835_v44 = vpop.f32.mrf.mxu0  ;;  %1177 = vmatpush.bf16.msra.mxu0 %v1905_v48 }
  0xa1   :  { %v848_v15 = vpop.f32.mrf.mxu1  ;;  %v836_v52 = vadd.f32 %v835_v44, %v154_v49  ;;  %1190 = vmatpush.bf16.msra.mxu1 %v1913_v24 }
  0xa3   :  { %v849_v55 = vadd.f32 %v848_v15, %v836_v52 }
  0xa8   :  { %v861_v45 = vpop.f32.mrf.mxu2  ;;  %v837_v50 = vpop.f32.mrf.mxu0 }
  0xa9   :  { %v874_v47 = vpop.f32.mrf.mxu3  ;;  %v850_v51 = vpop.f32.mrf.mxu1  ;;  %v862_v56 = vadd.f32 %v861_v45, %v849_v55  ;;  %v1921_v45 = vld [vmem:[%s2824_s4] ss:$0 sm:$0xff] }
  0xab   :  { %v875_v57 = vadd.f32 %v874_v47, %v862_v56 }
  0xb0   :  { %v863_v53 = vpop.f32.mrf.mxu2 }
  0xb1   :  { %v876_v54 = vpop.f32.mrf.mxu3 }
  0xc0   :  { %v887_v58 = vpop.f32.mrf.mxu0 }
  0xc1   :  { %v888_v59 = vadd.f32 %v887_v58, %v875_v57  ;;  %v900_v60 = vpop.f32.mrf.mxu1 }
  0xc3   :  { %v901_v61 = vadd.f32 %v900_v60, %v888_v59 }
  0xc8   :  { %v913_v62 = vpop.f32.mrf.mxu2  ;;  %v889_v4 = vpop.f32.mrf.mxu0 }
  0xc9   :  { %v914_v63 = vadd.f32 %v913_v62, %v901_v61  ;;  %v926_v0 = vpop.f32.mrf.mxu3  ;;  %v902_v7 = vpop.f32.mrf.mxu1 }
  0xcb   :  { %v927_v3 = vadd.f32 %v926_v0, %v914_v63 }
  0xcd   :  { %v1034_v8 = vmax.f32 %v927_v3, 0.0 }
  0xcf   :  { %v1036_v9 = vpack.c.bf16 %v1034_v8, %v1034_v8 }
  0xd0   :  { %v915_v11 = vpop.f32.mrf.mxu2 }
  0xd1   :  { %1178 = vmatmul.bf16.vlgmr.msra.gmra.mxu0 %v1036_v9  ;;  %v928_v12 = vpop.f32.mrf.mxu3 }
  0xe0   :  { %v939_v18 = vpop.f32.mrf.mxu0 }
  0xe1   :  { %v952_v19 = vpop.f32.mrf.mxu1  ;;  %v940_v29 = vadd.f32 %v939_v18, %v155_v26 }
  0xe3   :  { %v953_v30 = vadd.f32 %v952_v19, %v940_v29 }
  0xe8   :  { %v965_v21 = vpop.f32.mrf.mxu2  ;;  %v941_v23 = vpop.f32.mrf.mxu0 }
  0xe9   :  { %v978_v22 = vpop.f32.mrf.mxu3  ;;  %v954_v25 = vpop.f32.mrf.mxu1  ;;  %v966_v31 = vadd.f32 %v965_v21, %v953_v30 }
  0xeb   :  { %v979_v32 = vadd.f32 %v978_v22, %v966_v31 }
  0xf0   :  { %v967_v27 = vpop.f32.mrf.mxu2 }
  0xf1   :  { %v980_v28 = vpop.f32.mrf.mxu3 }
 0x100   :  { %v991_v33 = vpop.f32.mrf.mxu0 }
 0x101   :  { %v1004_v34 = vpop.f32.mrf.mxu1  ;;  %v992_v1 = vadd.f32 %v991_v33, %v979_v32 }
 0x103   :  { %v1005_v36 = vadd.f32 %v1004_v34, %v992_v1 }
 0x108   :  { %v1017_v37 = vpop.f32.mrf.mxu2  ;;  %v993_v42 = vpop.f32.mrf.mxu0 }
 0x109   :  { %v1018_v38 = vadd.f32 %v1017_v37, %v1005_v36  ;;  %v1030_v41 = vpop.f32.mrf.mxu3  ;;  %v1006_v6 = vpop.f32.mrf.mxu1 }
 0x10b   :  { %v1031_v14 = vadd.f32 %v1030_v41, %v1018_v38 }
 0x10d   :  { %v1035_v39 = vmax.f32 %v1031_v14, 0.0 }
 0x10f   :  { %v1037_v35 = vpack.c.bf16 %v1035_v39, %v1035_v39 }
 0x110   :  { %v1019_v40 = vpop.f32.mrf.mxu2 }
 0x111   :  { %v1032_v44 = vpop.f32.mrf.mxu3  ;;  %1191 = vmatmul.bf16.vlgmr.msra.gmra.mxu1 %v1037_v35 }
 0x14e   :  { %v1179_v15 = vpop.f32.mrf.mxu0 }
 0x14f   :  { %v1180_v46 = vadd.f32 %v1921_v45, %v1179_v15 }
 0x156   :  { %v1181_v43 = vpop.f32.mrf.mxu0 }
 0x18e   :  { %v1192_v47 = vpop.f32.mrf.mxu1 }
 0x18f   :  { %v1193_v48 = vadd.f32 %v1192_v47, %v1180_v46 }
 0x191   :  { %1196 = vst [vmem:[%s2826_s5] sm:$0xff] %v1193_v48 }
 0x196   :  { %v1194_v49 = vpop.f32.mrf.mxu1 }

</bundles_post_ra>
